<compile_context>
chip_gen: v6e
topology: v6e:2x2x1
jax: 0.10.0
libtpu: 0.0.40
codegen_flags: <defaults>
</compile_context>

<pallas_src>
import functools

import jax
import jax.numpy as jnp
import numpy as np
from jax.experimental import pallas as pl
from jax.experimental.pallas import tpu as pltpu

_LANE = 128
_SUBLANE = 8
_NEG_PAD = -1e9          # finite "minus infinity" for class-axis padding


def _round_up(x, m):
    return (x + m - 1) // m * m


def _consistency_kld_kernel(x_ref, t_ref, o_ref, *, inv_temp, inv_threshold,
                            use_mask, check_rows, n_rows, tile_rows):
    """One row tile: sharpened softmax / log-softmax / KL / mask -> partial sum."""
    x = x_ref[...].astype(jnp.float32)        # (TILE, Cp) input logits
    t = t_ref[...].astype(jnp.float32)        # (TILE, Cp) target logits

    # Shared target max (max(t / temp) = max(t) / temp since temp > 0).
    t_max = jnp.max(t, axis=-1, keepdims=True)
    t_shift = t - t_max

    # Sharpened target softmax, kept in shifted (log) space.
    ts_shift = t_shift * inv_temp
    ts_exp = jnp.exp(ts_shift)
    ts_sum = jnp.sum(ts_exp, axis=-1, keepdims=True)          # >= 1

    # Input log-softmax statistics (log_q never materialized as a full tile).
    x_shift = x - jnp.max(x, axis=-1, keepdims=True)
    x_sum = jnp.sum(jnp.exp(x_shift), axis=-1, keepdims=True)  # >= 1

    # Per-row KL without materializing p / log_p / log_q:
    #   KL = [sum_c ts_exp*(ts_shift - x_shift)] / ts_sum - log(ts_sum) + log(x_sum)
    # Padding columns: ts_exp underflows to 0, (ts_shift - x_shift) stays
    # finite -> exact 0 contribution.
    kl_un = jnp.sum(ts_exp * (ts_shift - x_shift), axis=-1, keepdims=True)
    kl = (kl_un * pl.reciprocal(ts_sum, approx=True)
          - jnp.log(ts_sum) + jnp.log(x_sum))                  # (TILE, 1)

    if use_mask:
        # max_c softmax(t) > thr  <=>  1 / sum_c exp(t - max t) > thr
        #                         <=>  sum_c exp(t - max t) < 1 / thr
        t_exp_sum = jnp.sum(jnp.exp(t_shift), axis=-1, keepdims=True)
        kl = jnp.where(t_exp_sum < inv_threshold, kl, 0.0)

    if check_rows:
        # Zero contributions from rows added by padding to a whole tile.
        row = (pl.program_id(0) * tile_rows
               + jax.lax.broadcasted_iota(jnp.int32, kl.shape, 0))
        kl = jnp.where(row < n_rows, kl, 0.0)

    # One partial per tile, stored at [0, 0] of a tile-aligned (8, 128) block
    # (single full-block unmasked store; rest of the block is zero).
    partial = jnp.sum(kl)
    rr = jax.lax.broadcasted_iota(jnp.int32, o_ref.shape, 0)
    cc = jax.lax.broadcasted_iota(jnp.int32, o_ref.shape, 1)
    o_ref[...] = jnp.where((rr == 0) & (cc == 0), partial, 0.0)


def consistency_kld_loss(input_logits, target_logits, *,
                         confid_threshold=0.0, softmax_temp=0.5,
                         tile_rows=512):
    """Pallas implementation of ConsistencyKLDLoss.forward."""
    if softmax_temp > 1.0:
        raise Exception(
            f"softmax_temp is expected to be lower than or equal to 1. "
            f"(given: {softmax_temp})")
    if softmax_temp == 1.0:
        # The reference module hits an UnboundLocalError in this case.
        raise Exception("softmax_temp == 1.0 is undefined in the reference module")

    assert input_logits.shape == target_logits.shape
    c = input_logits.shape[-1]
    rows = int(np.prod(input_logits.shape[:-1]))

    # Keep the native dtype (e.g. bf16) through the DMA; cast to f32 in-kernel.
    x = input_logits.reshape(rows, c)
    t = target_logits.reshape(rows, c)

    # Lane-pad the class axis to a multiple of 128 with a large finite negative.
    cp = _round_up(c, _LANE)
    if cp != c:
        pad = jnp.full((rows, cp - c), _NEG_PAD, dtype=x.dtype)
        x = jnp.concatenate([x, pad], axis=-1)
        t = jnp.concatenate([t, pad], axis=-1)

    # Tile sizing against a conservative VMEM budget (fits v5e/v6e/v7x scoped
    # limits): 2 inputs x 2 pipeline buffers in the input dtype plus ~5 f32
    # temporaries per (row, class) element.
    itemsize = int(np.dtype(x.dtype).itemsize)
    per_row_bytes = cp * (4 * itemsize + 5 * 4)
    budget = 12 * 1024 * 1024
    fit = max(_SUBLANE, (budget // per_row_bytes) // _SUBLANE * _SUBLANE)
    tile = int(min(_round_up(int(tile_rows), _SUBLANE), fit,
                   _round_up(rows, _SUBLANE)))

    # Pad rows to a whole number of tiles (padded rows masked out in-kernel).
    padded_rows = _round_up(rows, tile)
    if padded_rows != rows:
        x = jnp.pad(x, ((0, padded_rows - rows), (0, 0)))
        t = jnp.pad(t, ((0, padded_rows - rows), (0, 0)))
    num_tiles = padded_rows // tile

    kernel = functools.partial(
        _consistency_kld_kernel,
        inv_temp=1.0 / float(softmax_temp),
        inv_threshold=(1.0 / float(confid_threshold)
                       if confid_threshold > 0.0 else 0.0),
        use_mask=bool(confid_threshold > 0.0),
        check_rows=bool(padded_rows != rows),
        n_rows=rows,
        tile_rows=tile,
    )

    partials = pl.pallas_call(
        kernel,
        grid=(num_tiles,),
        out_shape=jax.ShapeDtypeStruct((num_tiles * _SUBLANE, _LANE), jnp.float32),
        in_specs=[
            pl.BlockSpec((tile, cp), lambda i: (i, 0)),
            pl.BlockSpec((tile, cp), lambda i: (i, 0)),
        ],
        out_specs=pl.BlockSpec((_SUBLANE, _LANE), lambda i: (i, 0)),
        compiler_params=pltpu.CompilerParams(
            dimension_semantics=("parallel",),
            vmem_limit_bytes=32 * 1024 * 1024,
        ),
    )(x, t)

    # Finish: sum the (few) per-tile partials and divide by the TRUE row count.
    return jnp.sum(partials) / rows


def _reference_jax(input_logits, target_logits, confid_threshold, softmax_temp):
    """Plain-JAX mirror of the PyTorch forward (for a sanity check)."""
    t_sharp = jax.nn.softmax(target_logits / softmax_temp, axis=-1)
    log_q = jax.nn.log_softmax(input_logits, axis=-1)
    kl = jnp.sum(t_sharp * (jnp.log(t_sharp) - log_q), axis=-1)
    t_soft = jax.nn.softmax(target_logits, axis=-1)
    mask = (jnp.max(t_soft, axis=-1) > confid_threshold).astype(kl.dtype)
    return jnp.mean(kl * mask)


if __name__ == "__main__":
    key = jax.random.PRNGKey(0)
    k1, k2, k3, k4 = jax.random.split(key, 4)

    # Case 1: small logits (batch=2, seq=8, classes=32), masked, f32.
    # Exercises class-axis lane padding (32 -> 128) and the mask branch.
    x1 = jax.random.normal(k1, (2, 8, 32), dtype=jnp.float32)
    t1 = jax.random.normal(k2, (2, 8, 32), dtype=jnp.float32)
    out1 = jax.block_until_ready(
        consistency_kld_loss(x1, t1, confid_threshold=0.1, softmax_temp=0.5))
    ref1 = _reference_jax(x1, t1, 0.1, 0.5)
    np.testing.assert_allclose(np.asarray(out1), np.asarray(ref1),
                               rtol=5e-3, atol=1e-5)

    # Case 2: multi-tile grid with a ragged last tile (rows=150, tile=64),
    # default threshold=0 (mask pass skipped), sharper temperature.
    x2 = jax.random.normal(k3, (3, 50, 128), dtype=jnp.float32)
    t2 = jax.random.normal(k4, (3, 50, 128), dtype=jnp.float32)
    out2 = jax.block_until_ready(
        consistency_kld_loss(x2, t2, confid_threshold=0.0, softmax_temp=0.25,
                             tile_rows=64))
    ref2 = _reference_jax(x2, t2, 0.0, 0.25)
    np.testing.assert_allclose(np.asarray(out2), np.asarray(ref2),
                               rtol=5e-3, atol=1e-5)

    # Case 3: bf16 inputs stay bf16 through the DMA (cast to f32 in-kernel).
    x3 = x1.astype(jnp.bfloat16)
    t3 = t1.astype(jnp.bfloat16)
    out3 = jax.block_until_ready(
        consistency_kld_loss(x3, t3, confid_threshold=0.1, softmax_temp=0.5))
    ref3 = _reference_jax(x3.astype(jnp.float32), t3.astype(jnp.float32), 0.1, 0.5)
    np.testing.assert_allclose(np.asarray(out3), np.asarray(ref3),
                               rtol=5e-3, atol=1e-5)

    print("KERNEL_OK")
</pallas_src>

<mosaic_0001>
module attributes {stable_mosaic.version = 11 : i64} {
  func.func @_consistency_kld_kernel(%arg0: i32, %arg1: memref<16x128xf32, #tpu.memory_space<vmem>>, %arg2: memref<16x128xf32, #tpu.memory_space<vmem>>, %arg3: memref<8x128xf32, #tpu.memory_space<vmem>>) attributes {dimension_semantics = [#tpu.dimension_semantics<parallel>], iteration_bounds = array<i64: 1>, scalar_prefetch = 0 : i64, scratch_operands = 0 : i64, tpu.core_type = #tpu.core_type<tc>, window_params = [{transform_indices = @transform_0, window_bounds = array<i64: 16, 128>}, {transform_indices = @transform_1, window_bounds = array<i64: 16, 128>}, {transform_indices = @transform_2, window_bounds = array<i64: 8, 128>}]} {
    %c0 = arith.constant 0 : index
    %c0_0 = arith.constant 0 : index
    %0 = vector.load %arg1[%c0, %c0_0] : memref<16x128xf32, #tpu.memory_space<vmem>>, vector<16x128xf32>
    %c0_1 = arith.constant 0 : index
    %c0_2 = arith.constant 0 : index
    %1 = vector.load %arg2[%c0_1, %c0_2] : memref<16x128xf32, #tpu.memory_space<vmem>>, vector<16x128xf32>
    %cst = arith.constant dense<0xFF800000> : vector<16xf32>
    %2 = vector.multi_reduction <maximumf>, %1, %cst [1] : vector<16x128xf32> to vector<16xf32>
    %3 = vector.shape_cast %2 : vector<16xf32> to vector<16x1xf32>
    %4 = vector.broadcast %3 : vector<16x1xf32> to vector<16x128xf32>
    %5 = arith.subf %1, %4 : vector<16x128xf32>
    %cst_3 = arith.constant 2.000000e+00 : f32
    %6 = vector.broadcast %cst_3 : f32 to vector<16x128xf32>
    %7 = arith.mulf %5, %6 : vector<16x128xf32>
    %8 = math.exp %7 : vector<16x128xf32>
    %cst_4 = arith.constant dense<0.000000e+00> : vector<16xf32>
    %9 = vector.multi_reduction <add>, %8, %cst_4 [1] : vector<16x128xf32> to vector<16xf32>
    %10 = vector.shape_cast %9 : vector<16xf32> to vector<16x1xf32>
    %cst_5 = arith.constant dense<0xFF800000> : vector<16xf32>
    %11 = vector.multi_reduction <maximumf>, %0, %cst_5 [1] : vector<16x128xf32> to vector<16xf32>
    %12 = vector.shape_cast %11 : vector<16xf32> to vector<16x1xf32>
    %13 = vector.broadcast %12 : vector<16x1xf32> to vector<16x128xf32>
    %14 = arith.subf %0, %13 : vector<16x128xf32>
    %15 = math.exp %14 : vector<16x128xf32>
    %cst_6 = arith.constant dense<0.000000e+00> : vector<16xf32>
    %16 = vector.multi_reduction <add>, %15, %cst_6 [1] : vector<16x128xf32> to vector<16xf32>
    %17 = vector.shape_cast %16 : vector<16xf32> to vector<16x1xf32>
    %18 = arith.subf %7, %14 : vector<16x128xf32>
    %19 = arith.mulf %8, %18 : vector<16x128xf32>
    %cst_7 = arith.constant dense<0.000000e+00> : vector<16xf32>
    %20 = vector.multi_reduction <add>, %19, %cst_7 [1] : vector<16x128xf32> to vector<16xf32>
    %21 = vector.shape_cast %20 : vector<16xf32> to vector<16x1xf32>
    %22 = tpu.reciprocal %10 {approx = true} : vector<16x1xf32> -> vector<16x1xf32>
    %23 = arith.mulf %21, %22 : vector<16x1xf32>
    %24 = math.log %10 : vector<16x1xf32>
    %25 = arith.subf %23, %24 : vector<16x1xf32>
    %26 = math.log %17 : vector<16x1xf32>
    %27 = arith.addf %25, %26 : vector<16x1xf32>
    %28 = math.exp %5 : vector<16x128xf32>
    %cst_8 = arith.constant dense<0.000000e+00> : vector<16xf32>
    %29 = vector.multi_reduction <add>, %28, %cst_8 [1] : vector<16x128xf32> to vector<16xf32>
    %30 = vector.shape_cast %29 : vector<16xf32> to vector<16x1xf32>
    %cst_9 = arith.constant 1.000000e+01 : f32
    %31 = vector.broadcast %cst_9 : f32 to vector<16x1xf32>
    %32 = arith.cmpf olt, %30, %31 : vector<16x1xf32>
    %cst_10 = arith.constant 0.000000e+00 : f32
    %33 = vector.broadcast %cst_10 : f32 to vector<16x1xf32>
    %34 = arith.select %32, %27, %33 : vector<16x1xi1>, vector<16x1xf32>
    %35 = vector.shape_cast %34 : vector<16x1xf32> to vector<1x16x1xf32>
    %cst_11 = arith.constant dense<0.000000e+00> : vector<1xf32>
    %36 = vector.multi_reduction <add>, %35, %cst_11 [1, 2] : vector<1x16x1xf32> to vector<1xf32>
    %37 = vector.shape_cast %36 : vector<1xf32> to vector<1x1x1xf32>
    %38 = vector.extract %37[0, 0, 0] : f32 from vector<1x1x1xf32>
    %39 = tpu.iota {dimensions = array<i32: 0>} : vector<8x128xi32>
    %40 = tpu.iota {dimensions = array<i32: 1>} : vector<8x128xi32>
    %c0_i32 = arith.constant 0 : i32
    %41 = vector.broadcast %c0_i32 : i32 to vector<8x128xi32>
    %42 = arith.cmpi eq, %39, %41 : vector<8x128xi32>
    %c0_i32_12 = arith.constant 0 : i32
    %43 = vector.broadcast %c0_i32_12 : i32 to vector<8x128xi32>
    %44 = arith.cmpi eq, %40, %43 : vector<8x128xi32>
    %45 = arith.andi %42, %44 : vector<8x128xi1>
    %cst_13 = arith.constant 0.000000e+00 : f32
    %46 = vector.broadcast %38 : f32 to vector<8x128xf32>
    %47 = vector.broadcast %cst_13 : f32 to vector<8x128xf32>
    %48 = arith.select %45, %46, %47 : vector<8x128xi1>, vector<8x128xf32>
    %c0_14 = arith.constant 0 : index
    %c0_15 = arith.constant 0 : index
    %49 = vector.load %arg3[%c0_14, %c0_15] : memref<8x128xf32, #tpu.memory_space<vmem>>, vector<8x128xf32>
    tpu.vector_store %arg3[%c0_14, %c0_15], %48 {strides = array<i32>} : memref<8x128xf32, #tpu.memory_space<vmem>>, vector<8x128xf32>,
    return
  }
  func.func @transform_0(%arg0: i32) -> (i32, i32) {
    %c0_i32 = arith.constant 0 : i32
    %c0_i32_0 = arith.constant 0 : i32
    return %arg0, %c0_i32 : i32, i32
  }
  func.func @transform_1(%arg0: i32) -> (i32, i32) {
    %c0_i32 = arith.constant 0 : i32
    %c0_i32_0 = arith.constant 0 : i32
    return %arg0, %c0_i32 : i32, i32
  }
  func.func @transform_2(%arg0: i32) -> (i32, i32) {
    %c0_i32 = arith.constant 0 : i32
    %c0_i32_0 = arith.constant 0 : i32
    return %arg0, %c0_i32 : i32, i32
  }
}

</mosaic_0001>

<bundles_post_ra>
// kernel: tpu_custom_call.1
= control target key start
LH: loop header
LB: loop body
LE: loop exit
PB: predicated region body
PF: predicated region fallthrough
CT: control target
= control target key end

     0   :  { %7 = vsyncpa [#allocation3], 0  ;;  %s275_s0 = inlined_call_operand.hbm [shape: f32[16,128], index: 0, kind: input, shape index: {}]   ;;  %s276_s1 = inlined_call_operand.hbm [shape: f32[16,128], index: 1, kind: input, shape index: {}]   ;;  %s277_s2 = inlined_call_operand.hbm [shape: f32[8,128], index: 2, kind: output, shape index: {}]  }
   0x1   :  { %8 = vsyncpa [#allocation6], 0 }
   0x2   :  { %9 = vsyncpa [#allocation4], 0  ;;  %s246_s9 = smov [#allocation2]  }
   0x3   :  { %s15_s10 = sshll.u32 %s246_s9, 4  ;;  %s16_s10 = int_to_ptr.vmem [resolvable:$true] %s15_s10 }
   0x4   :  { %s188_s11 = scalar_lea.vmem %s16_s10, 256  ;;  %p193_p1 = scmp.lt.s32.totalorder %s16_s10, %s16_s10 }
   0x5   :  { %p189_p0 = scmp.ne.s32.totalorder %s16_s10, %s188_s11  ;;  %p194_p2 = scmp.lt.s32.totalorder %s188_s11, %s188_s11 }
   0x7   :  { %p195_p3 = por %p194_p2, %p193_p1 }
   0x9   :  { %p196_p4 = pnand %p195_p3, %p189_p0 }
   0xb   :  { %199 = shalt.err (!%p196_p4)
}
   0xc   :  { %s247_s12 = smov 128   ;;  %s248_s13 = smov 8  }
   0xd   :  { %21 = dma.hbm_to_vmem [thread:$0]  %s275_s0, 256, %s16_s10, [#allocation3], %s247_s12, %s247_s12, %s248_s13  }
   0xe   :  { %s249_s16 = smov [#allocation5]  }
   0xf   :  { %s27_s17 = sshll.u32 %s249_s16, 4  ;;  %s28_s17 = int_to_ptr.vmem [resolvable:$true] %s27_s17 }
  0x10   :  { %s208_s18 = scalar_lea.vmem %s28_s17, 256  ;;  %p213_p6 = scmp.lt.s32.totalorder %s28_s17, %s28_s17 }
  0x11   :  { %p209_p5 = scmp.ne.s32.totalorder %s28_s17, %s208_s18  ;;  %p214_p7 = scmp.lt.s32.totalorder %s208_s18, %s208_s18 }
  0x13   :  { %p215_p8 = por %p214_p7, %p213_p6 }
  0x15   :  { %p216_p9 = pnand %p215_p8, %p209_p5 }
  0x17   :  { %219 = shalt.err (!%p216_p9)
}
  0x18   :  { %33 = dma.hbm_to_vmem [thread:$0]  %s276_s1, 256, %s28_s17, [#allocation6], %s247_s12, %s247_s12, %s248_s13  }
  0x19   :  { %240 = dma.done.wait [#allocation3], 256  }
  0x1a   :  { %241 = vsyncadd [#allocation3], 4294967040 }
  0x1b   :  { %242 = dma.done.wait [#allocation6], 256  }
  0x1c   :  { %243 = vsyncadd [#allocation6], 4294967040  ;;  %v42_v0 = vld [vmem:[#allocation5] sm:$0xff]  ;;  %v40_v1 = vld [vmem:[#allocation2] sm:$0xff]  ;;  %vm110_vm1 = vcmask 7168   ;;  %s250_s0 = smov [#allocation7]  }
  0x1d   :  { %44 = vmax.xlane.f32.xlu0 %v42_v0  ;;  %60 = vmax.xlane.f32.xlu1 %v40_v1  ;;  %v43_v2 = vld [vmem:[#allocation5 + $0x8] sm:$0xff]  ;;  %v41_v3 = vld [vmem:[#allocation2 + $0x8] sm:$0xff]  ;;  %s139_s1 = sshll.u32 %s250_s0, 4  ;;  %s140_s1 = int_to_ptr.vmem [resolvable:$true] %s139_s1 }
  0x1e   :  { %s220_s22 = scalar_lea.vmem %s140_s1, 128  ;;  %p225_p11 = scmp.lt.s32.totalorder %s140_s1, %s140_s1 }
  0x1f   :  { %p221_p10 = scmp.ne.s32.totalorder %s140_s1, %s220_s22  ;;  %p226_p12 = scmp.lt.s32.totalorder %s220_s22, %s220_s22 }
  0x21   :  { %46 = vmax.xlane.f32.xlu0 %v43_v2  ;;  %62 = vmax.xlane.f32.xlu1 %v41_v3  ;;  %p227_p13 = por %p226_p12, %p225_p11 }
  0x23   :  { %p228_p0 = pnand %p227_p13, %p221_p10 }
  0xa6   :  { %v45_v4 = vpop.xlane.xlu0 %44  ;;  %v61_v5 = vpop.xlane.xlu1 %60 }
  0xa7   :  { %v48_v6 = vsub.f32 %v42_v0, %v45_v4  ;;  %v64_v8 = vsub.f32 %v40_v1, %v61_v5 }
  0xa9   :  { %v50_v7 = vmul.f32 2.0, %v48_v6  ;;  %v66_v12 = vmul.f32 1.442695, %v64_v8  ;;  %v98_v18 = vmul.f32 1.442695, %v48_v6 }
  0xaa   :  { %v47_v9 = vpop.xlane.xlu0 %46  ;;  %v63_v10 = vpop.xlane.xlu1 %62 }
  0xab   :  { %v52_v11 = vmul.f32 1.442695, %v50_v7  ;;  %v49_v13 = vsub.f32 %v43_v2, %v47_v9  ;;  %v65_v15 = vsub.f32 %v41_v3, %v63_v10  ;;  %v74_v23 = vsub.f32 %v50_v7, %v64_v8 }
  0xac   :  { %v123_v2 = vlaneseq }
  0xad   :  { %156 = vpow2.f32 %v52_v11  ;;  %v51_v14 = vmul.f32 2.0, %v49_v13  ;;  %v68_v17 = vmul.f32 1.442695, %v65_v15  ;;  %v100_v19 = vmul.f32 1.442695, %v49_v13 }
  0xae   :  { %158 = vpow2.f32 %v66_v12  ;;  %v124_v3 = vshrl.u32 %v123_v2, 7  ;;  %v126_v4 = vand.u32 127, %v123_v2 }
  0xaf   :  { %v54_v16 = vmul.f32 1.442695, %v51_v14  ;;  %v75_v26 = vsub.f32 %v51_v14, %v65_v15 }
  0xb0   :  { %vm127_vm3 = vcmp.eq.s32.totalorder %v124_v3, 0  ;;  %vm128_vm4 = vcmp.eq.s32.totalorder %v126_v4, 0 }
  0xb1   :  { %160 = vpow2.f32 %v54_v16  ;;  %vm129_vm5 = vmand %vm127_vm3, %vm128_vm4 }
  0xb2   :  { %162 = vpow2.f32 %v68_v17 }
  0xb3   :  { %164 = vpow2.f32 %v98_v18 }
  0xb4   :  { %166 = vpow2.f32 %v100_v19 }
  0xba   :  { %v157_v20 = vpop.eup %156 }
  0xbb   :  { %56 = vadd.xlane.f32.xlu0 %v157_v20  ;;  %v159_v21 = vpop.eup %158  ;;  %v76_v25 = vmul.f32 %v157_v20, %v74_v23 }
  0xbe   :  { %v161_v22 = vpop.eup %160 }
  0xbf   :  { %58 = vadd.xlane.f32.xlu1 %v161_v22  ;;  %70 = vadd.xlane.f32.xlu0 %v159_v21  ;;  %v163_v24 = vpop.eup %162  ;;  %v77_v27 = vmul.f32 %v161_v22, %v75_v26 }
  0xc0   :  { %v165_v28 = vpop.eup %164 }
  0xc1   :  { %v167_v29 = vpop.eup %166 }
  0xc3   :  { %78 = vadd.xlane.f32.xlu0 %v76_v25  ;;  %72 = vadd.xlane.f32.xlu1 %v163_v24 }
  0xc7   :  { %102 = vadd.xlane.f32.xlu0 %v165_v28  ;;  %80 = vadd.xlane.f32.xlu1 %v77_v27 }
  0xcb   :  { %104 = vadd.xlane.f32.xlu1 %v167_v29 }
 0x144   :  { %v57_v30 = vpop.xlane.xlu0 %56 }
 0x145   :  { %168 = vrcp.f32 %v57_v30 }
 0x146   :  { %170 = vlog2.f32 %v57_v30 }
 0x148   :  { %v71_v31 = vpop.xlane.xlu0 %70  ;;  %v59_v32 = vpop.xlane.xlu1 %58 }
 0x149   :  { %172 = vlog2.f32 %v71_v31 }
 0x14a   :  { %174 = vrcp.f32 %v59_v32 }
 0x14b   :  { %176 = vlog2.f32 %v59_v32 }
 0x14c   :  { %v73_v33 = vpop.xlane.xlu1 %72  ;;  %v79_v35 = vpop.xlane.xlu0 %78 }
 0x14d   :  { %178 = vlog2.f32 %v73_v33 }
 0x150   :  { %v81_v39 = vpop.xlane.xlu1 %80  ;;  %v103_v47 = vpop.xlane.xlu0 %102 }
 0x151   :  { %vm106_vm0 = vcmp.lt.f32.partialorder %v103_v47, 10.0 }
 0x152   :  { %v169_v34 = vpop.eup %168 }
 0x153   :  { %v171_v36 = vpop.eup %170  ;;  %v84_v37 = vmul.f32 %v169_v34, %v79_v35 }
 0x154   :  { %v87_v38 = vmul.f32 0.6931472, %v171_v36  ;;  %v105_v52 = vpop.xlane.xlu1 %104 }
 0x155   :  { %vm107_vm2 = vcmp.lt.f32.partialorder %v105_v52, 10.0 }
 0x156   :  { %v173_v40 = vpop.eup %172  ;;  %v90_v43 = vsub.f32 %v84_v37, %v87_v38 }
 0x157   :  { %v175_v41 = vpop.eup %174  ;;  %v93_v42 = vmul.f32 0.6931472, %v173_v40 }
 0x158   :  { %v177_v44 = vpop.eup %176  ;;  %v85_v45 = vmul.f32 %v175_v41, %v81_v39 }
 0x159   :  { %v96_v46 = vadd.f32 %v93_v42, %v90_v43  ;;  %v89_v48 = vmul.f32 0.6931472, %v177_v44 }
 0x15a   :  { %v179_v49 = vpop.eup %178 }
 0x15b   :  { %v95_v50 = vmul.f32 0.6931472, %v179_v49  ;;  %v91_v51 = vsub.f32 %v85_v45, %v89_v48  ;;  %v108_v53 = vsel %vm106_vm0, %v96_v46, 0.0 }
 0x15c   :  { %v111_v57 = vsel %vm110_vm1, %v108_v53, 0.0 }
 0x15d   :  { %v97_v54 = vadd.f32 %v95_v50, %v91_v51 }
 0x15f   :  { %v109_v55 = vsel %vm107_vm2, %v97_v54, 0.0 }
 0x160   :  { %v112_v56 = vsel %vm110_vm1, %v109_v55, 0.0 }
 0x161   :  { %v113_v58 = vadd.f32 %v112_v56, %v111_v57 }
 0x163   :  { %114 = vadd.xlane.f32.xlu0 %v113_v58 }
 0x1ec   :  { %v115_v59 = vpop.xlane.xlu0 %114 }
 0x1ed   :  { %v116_v60 = vrot.slane %v115_v59, 4 }
 0x1ef   :  { %v117_v61 = vadd.f32 %v116_v60, %v115_v59 }
 0x1f1   :  { %v118_v62 = vrot.slane %v117_v61, 2 }
 0x1f3   :  { %v119_v63 = vadd.f32 %v118_v62, %v117_v61 }
 0x1f5   :  { %v120_v0 = vrot.slane %v119_v63, 1 }
 0x1f7   :  { %v121_v1 = vadd.f32 %v120_v0, %v119_v63 }
 0x1f9   :  { %149 = vpush %v121_v1 }
 0x22a   :  { %s150_s21 = spop %149 }
 0x22b   :  { %v130_v5 = vstv %s150_s21 }
 0x22c   :  { %v131_v6 = vsel %vm129_vm5, %v130_v5, 0.0 }
 0x22d   :  { %132 = vst [vmem:[#allocation7] sm:$0xff] %v131_v6 }
 0x22e   :  { %231 = shalt.err (!%p228_p0)
}
 0x22f   :  { %142 = dma.vmem_to_hbm [thread:$0]  %s140_s1, 128, %s277_s2, [#allocation4]  }
 0x230   :  { %244 = dma.done.wait [#allocation4], 128  }
 0x231   :  { %245 = vsyncadd [#allocation4], 4294967168 }
 0x232   :  { %146 = vsyncpa [#allocation3], 1 }
 0x233   :  { %147 = vsyncpa [#allocation6], 1 }
 0x234   :  { %148 = vsyncpa [#allocation4], 1 }

</bundles_post_ra>
